<compile_context>
chip_gen: v7x
topology: tpu7x:2x2x1
jax: 0.10.0
libtpu: 0.0.40
codegen_flags: <defaults>
</compile_context>

<pallas_src>
import jax
import jax.numpy as jnp
from jax.experimental import pallas as pl
from jax.experimental.pallas import tpu as pltpu


LANE = 128
HEAD_PAD = LANE  # fused alpha|beta head padded to one lane-dense 128-wide tile


def _round_up(n, m):
    return ((n + m - 1) // m) * m


# ----------------------------------------------------------------------------
# Pallas kernel: full MLP (3 hidden layers + fused 2-column head) per batch tile
# ----------------------------------------------------------------------------
def _softplus(x):
    # numerically-stable softplus, matches torch.nn.Softplus semantics
    return jnp.maximum(x, 0.0) + jnp.log1p(jnp.exp(-jnp.abs(x)))


def actor_kernel(x_ref,
                 w1_ref, b1_ref,
                 w2_ref, b2_ref,
                 w3_ref, b3_ref,
                 wh_ref, bh_ref,
                 out_ref):
    cdt = w1_ref.dtype  # compute dtype of the weights (f32 or bf16)

    # in-kernel cast (no-op for f32 weights; VPU work hidden under pipeline
    # for bf16 weights, avoiding an extra XLA pass over x in the wrapper)
    h = x_ref[...].astype(cdt)

    h = jnp.dot(h, w1_ref[...],
                preferred_element_type=jnp.float32) + b1_ref[...]
    h = jnp.maximum(h, 0.0).astype(cdt)                              # [TB, 256]

    h = jnp.dot(h, w2_ref[...],
                preferred_element_type=jnp.float32) + b2_ref[...]
    h = jnp.maximum(h, 0.0).astype(cdt)                              # [TB, 128]

    h = jnp.dot(h, w3_ref[...],
                preferred_element_type=jnp.float32) + b3_ref[...]
    h = jnp.maximum(h, 0.0).astype(cdt)                              # [TB, 128] (64 real + 64 zero-padded)

    # fused alpha|beta head: real columns [0:od] = alpha, [od:2od] = beta
    y = jnp.dot(h, wh_ref[...],
                preferred_element_type=jnp.float32) + bh_ref[...]    # [TB, 128]

    ow = out_ref.shape[-1]                                           # 2*output_dim
    out_ref[...] = _softplus(y[:, :ow]) + 1.0                        # slim store


# ----------------------------------------------------------------------------
# Parameter construction (deterministic BayesLinear sampling, plain JAX glue).
# ----------------------------------------------------------------------------
def _bayes_linear_params(key, in_features, out_features, prior_sigma=0.1):
    """Deterministically sample one realization of a BayesLinear layer.

    Returns W [in, out] (already transposed for x @ W) and b [1, out].
    """
    k_mu, k_eps_w, k_bmu, k_eps_b = jax.random.split(key, 4)
    w_mu = 0.1 * jax.random.normal(k_mu, (out_features, in_features), jnp.float32)
    w_log_sigma = jnp.full((out_features, in_features), jnp.log(prior_sigma), jnp.float32)
    w_eps = jax.random.normal(k_eps_w, (out_features, in_features), jnp.float32)
    w = w_mu + jnp.exp(w_log_sigma) * w_eps                          # [out, in]

    b_mu = 0.1 * jax.random.normal(k_bmu, (out_features,), jnp.float32)
    b_log_sigma = jnp.full((out_features,), jnp.log(prior_sigma), jnp.float32)
    b_eps = jax.random.normal(k_eps_b, (out_features,), jnp.float32)
    b = b_mu + jnp.exp(b_log_sigma) * b_eps                          # [out]

    return w.T, b[None, :]                                           # [in,out], [1,out]


def make_actor_params(key, state_stack, input_dim, output_dim=1,
                      architecture=(256, 128, 64), dtype=jnp.float32):
    """Build kernel-ready params:
      * transposed hidden layers, the LAST one zero-padded to a lane multiple
        (128) of output columns so the final activation tile is lane-dense,
      * one fused, 128-lane-padded head (alpha cols [0:od], beta cols [od:2od]).
    All padding/fusion happens here (once), not in the hot path.
    Use dtype=jnp.bfloat16 on v6e/v7x to halve weight traffic."""
    assert 2 * output_dim <= HEAD_PAD
    d_in = state_stack * input_dim
    keys = jax.random.split(key, len(architecture) + 2)

    layers = []
    prev = d_in
    for i, hdim in enumerate(architecture):
        w, b = _bayes_linear_params(keys[i], prev, hdim)
        layers.append([w, b])
        prev = hdim

    # Zero-pad last hidden layer to a multiple of 128 output columns (ReLU of
    # the padded (zero) columns stays zero, and the head rows for them are
    # zero, so results are bit-identical).
    h_last = architecture[-1]
    h_pad = _round_up(h_last, LANE)
    if h_pad != h_last:
        w3, b3 = layers[-1]
        w3p = jnp.zeros((w3.shape[0], h_pad), jnp.float32).at[:, :h_last].set(w3)
        b3p = jnp.zeros((1, h_pad), jnp.float32).at[:, :h_last].set(b3)
        layers[-1] = [w3p, b3p]

    # fused alpha|beta head
    wa, ba = _bayes_linear_params(keys[-2], h_last, output_dim)
    wb, bb = _bayes_linear_params(keys[-1], h_last, output_dim)

    wh = jnp.zeros((h_pad, HEAD_PAD), jnp.float32)
    wh = wh.at[:h_last, :output_dim].set(wa)
    wh = wh.at[:h_last, output_dim:2 * output_dim].set(wb)
    bh = jnp.zeros((1, HEAD_PAD), jnp.float32)
    bh = bh.at[:, :output_dim].set(ba).at[:, output_dim:2 * output_dim].set(bb)

    layers = tuple((w.astype(dtype), b.astype(jnp.float32)) for w, b in layers)
    return layers, wh.astype(dtype), bh.astype(jnp.float32)


# ----------------------------------------------------------------------------
# Wrapper: batch-tiled pallas_call + head split.
# ----------------------------------------------------------------------------
def actor_forward(x, params, output_dim=1, batch_tile=1024):
    """x: [B, state_stack, input_dim] (any [B, ...]) -> (alpha [B,od], beta [B,od])."""
    layers, wh, bh = params
    (w1, b1), (w2, b2), (w3, b3) = layers

    B = x.shape[0]
    x2 = x.reshape(B, -1)                    # x.view(B, -1); dtype cast is in-kernel
    d_in = x2.shape[1]
    out_w = 2 * output_dim                   # fused alpha|beta columns

    # Batch tile: multiple of 8 sublanes, capped at batch_tile, and small
    # enough that the parallel grid has >= 2 steps once B >= 16 so both v7x
    # TensorCores get work (irrelevant but harmless on 1-TC v5e/v6e).
    TB = min(batch_tile, _round_up(pl.cdiv(B, 2), 8))
    grid = (pl.cdiv(B, TB),)

    const = lambda i: (0, 0)   # weights/biases stay VMEM-resident across tiles
    in_specs = [
        pl.BlockSpec((TB, d_in), lambda i: (i, 0)),
        pl.BlockSpec(w1.shape, const), pl.BlockSpec(b1.shape, const),
        pl.BlockSpec(w2.shape, const), pl.BlockSpec(b2.shape, const),
        pl.BlockSpec(w3.shape, const), pl.BlockSpec(b3.shape, const),
        pl.BlockSpec(wh.shape, const), pl.BlockSpec(bh.shape, const),
    ]
    # slim output: last block dim equals the full array dim (2*output_dim)
    out_spec = pl.BlockSpec((TB, out_w), lambda i: (i, 0))

    # dtype-aware cost estimate (scheduling hint only)
    w_list = (w1, w2, w3, wh)
    b_list = (b1, b2, b3, bh)
    w_params = sum(int(w.size) for w in w_list)
    w_bytes = sum(int(w.size) * w.dtype.itemsize for w in w_list)
    b_bytes = sum(int(b.size) * b.dtype.itemsize for b in b_list)
    cost = pl.CostEstimate(
        flops=2 * B * w_params,
        transcendentals=B * out_w,
        bytes_accessed=(B * d_in * x2.dtype.itemsize      # x in
                        + B * out_w * 4                   # slim f32 out
                        + w_bytes + b_bytes),
    )

    out = pl.pallas_call(
        actor_kernel,
        out_shape=jax.ShapeDtypeStruct((B, out_w), jnp.float32),
        grid=grid,
        in_specs=in_specs,
        out_specs=out_spec,
        compiler_params=pltpu.CompilerParams(
            dimension_semantics=("parallel",)),
        cost_estimate=cost,
    )(x2, w1, b1, w2, b2, w3, b3, wh, bh)

    alpha = out[:, :output_dim]
    beta = out[:, output_dim:2 * output_dim]
    return alpha, beta


# ----------------------------------------------------------------------------
# Pure-JAX reference for a sanity check.
# ----------------------------------------------------------------------------
def actor_ref(x, params, output_dim=1):
    layers, wh, bh = params
    B = x.shape[0]
    h = x.reshape(B, -1).astype(jnp.float32)
    for (w, b) in layers:
        h = jnp.maximum(h @ w.astype(jnp.float32) + b, 0.0)
    y = jax.nn.softplus(h @ wh.astype(jnp.float32) + bh) + 1.0
    return y[:, :output_dim], y[:, output_dim:2 * output_dim]


if __name__ == "__main__":
    key = jax.random.PRNGKey(0)
    k_x, k_p = jax.random.split(key)

    # small shapes consistent with the module: state_stack=4, input_dim=11
    B, state_stack, input_dim = 8, 4, 11
    x = jax.random.normal(k_x, (B, state_stack, input_dim), jnp.float32)

    # f32 weights: strict correctness check vs. pure-JAX reference
    params = make_actor_params(
        k_p, state_stack, input_dim, output_dim=1, architecture=(256, 128, 64),
        dtype=jnp.float32)

    alpha, beta = actor_forward(x, params, output_dim=1)
    alpha, beta = jax.block_until_ready((alpha, beta))

    alpha_r, beta_r = actor_ref(x, params, output_dim=1)
    assert alpha.shape == (B, 1) and beta.shape == (B, 1)
    assert jnp.allclose(alpha, alpha_r, rtol=1e-5, atol=1e-5)
    assert jnp.allclose(beta, beta_r, rtol=1e-5, atol=1e-5)
    assert bool(jnp.all(alpha > 1.0)) and bool(jnp.all(beta > 1.0))

    # bf16 weight path (recommended on v6e/v7x for ~2x weight bandwidth):
    # smoke test only -- bf16 cannot meet the 1e-5 f32 tolerance by construction.
    params_bf16 = make_actor_params(
        k_p, state_stack, input_dim, output_dim=1, architecture=(256, 128, 64),
        dtype=jnp.bfloat16)
    a16, b16 = jax.block_until_ready(actor_forward(x, params_bf16, output_dim=1))
    assert a16.shape == (B, 1) and b16.shape == (B, 1)
    assert bool(jnp.all(jnp.isfinite(a16))) and bool(jnp.all(jnp.isfinite(b16)))
    assert bool(jnp.all(a16 > 1.0)) and bool(jnp.all(b16 > 1.0))

    print("KERNEL_OK")
</pallas_src>

<mosaic_0001>
module attributes {stable_mosaic.version = 11 : i64} {
  func.func @actor_kernel(%arg0: i32, %arg1: memref<8x44xf32, #tpu.memory_space<vmem>>, %arg2: memref<44x256xf32, #tpu.memory_space<vmem>>, %arg3: memref<1x256xf32, #tpu.memory_space<vmem>>, %arg4: memref<256x128xf32, #tpu.memory_space<vmem>>, %arg5: memref<1x128xf32, #tpu.memory_space<vmem>>, %arg6: memref<128x128xf32, #tpu.memory_space<vmem>>, %arg7: memref<1x128xf32, #tpu.memory_space<vmem>>, %arg8: memref<128x128xf32, #tpu.memory_space<vmem>>, %arg9: memref<1x128xf32, #tpu.memory_space<vmem>>, %arg10: memref<8x2xf32, #tpu.memory_space<vmem>>) attributes {dimension_semantics = [#tpu.dimension_semantics<parallel>], iteration_bounds = array<i64: 1>, scalar_prefetch = 0 : i64, scratch_operands = 0 : i64, tpu.core_type = #tpu.core_type<tc>, window_params = [{transform_indices = @transform_0, window_bounds = array<i64: 8, 44>}, {pipeline_mode = #tpu.pipeline_mode<synchronous>, transform_indices = @transform_1, window_bounds = array<i64: 44, 256>}, {pipeline_mode = #tpu.pipeline_mode<synchronous>, transform_indices = @transform_2, window_bounds = array<i64: 1, 256>}, {pipeline_mode = #tpu.pipeline_mode<synchronous>, transform_indices = @transform_3, window_bounds = array<i64: 256, 128>}, {pipeline_mode = #tpu.pipeline_mode<synchronous>, transform_indices = @transform_4, window_bounds = array<i64: 1, 128>}, {pipeline_mode = #tpu.pipeline_mode<synchronous>, transform_indices = @transform_5, window_bounds = array<i64: 128, 128>}, {pipeline_mode = #tpu.pipeline_mode<synchronous>, transform_indices = @transform_6, window_bounds = array<i64: 1, 128>}, {pipeline_mode = #tpu.pipeline_mode<synchronous>, transform_indices = @transform_7, window_bounds = array<i64: 128, 128>}, {pipeline_mode = #tpu.pipeline_mode<synchronous>, transform_indices = @transform_8, window_bounds = array<i64: 1, 128>}, {transform_indices = @transform_9, window_bounds = array<i64: 8, 2>}]} {
    %c0 = arith.constant 0 : index
    %c0_0 = arith.constant 0 : index
    %0 = vector.load %arg1[%c0, %c0_0] : memref<8x44xf32, #tpu.memory_space<vmem>>, vector<8x44xf32>
    %c0_1 = arith.constant 0 : index
    %c0_2 = arith.constant 0 : index
    %1 = vector.load %arg2[%c0_1, %c0_2] : memref<44x256xf32, #tpu.memory_space<vmem>>, vector<44x256xf32>
    %cst = arith.constant dense<0.000000e+00> : vector<8x256xf32>
    %2 = tpu.matmul %0, %1, %cst {dimension_numbers = #tpu.dot_dimension_numbers<[1], [0], [0], [1], [0, 0, 1, 1], [], []>} : vector<8x44xf32>, vector<44x256xf32>, vector<8x256xf32> -> vector<8x256xf32>
    %c0_3 = arith.constant 0 : index
    %c0_4 = arith.constant 0 : index
    %3 = vector.load %arg3[%c0_3, %c0_4] : memref<1x256xf32, #tpu.memory_space<vmem>>, vector<1x256xf32>
    %4 = vector.broadcast %3 : vector<1x256xf32> to vector<8x256xf32>
    %5 = arith.addf %2, %4 : vector<8x256xf32>
    %cst_5 = arith.constant 0.000000e+00 : f32
    %6 = vector.broadcast %cst_5 : f32 to vector<8x256xf32>
    %7 = arith.maximumf %5, %6 : vector<8x256xf32>
    %c0_6 = arith.constant 0 : index
    %c0_7 = arith.constant 0 : index
    %8 = vector.load %arg4[%c0_6, %c0_7] : memref<256x128xf32, #tpu.memory_space<vmem>>, vector<256x128xf32>
    %cst_8 = arith.constant dense<0.000000e+00> : vector<8x128xf32>
    %9 = tpu.matmul %7, %8, %cst_8 {dimension_numbers = #tpu.dot_dimension_numbers<[1], [0], [0], [1], [0, 0, 1, 1], [], []>} : vector<8x256xf32>, vector<256x128xf32>, vector<8x128xf32> -> vector<8x128xf32>
    %c0_9 = arith.constant 0 : index
    %c0_10 = arith.constant 0 : index
    %10 = vector.load %arg5[%c0_9, %c0_10] : memref<1x128xf32, #tpu.memory_space<vmem>>, vector<1x128xf32>
    %11 = vector.broadcast %10 : vector<1x128xf32> to vector<8x128xf32>
    %12 = arith.addf %9, %11 : vector<8x128xf32>
    %cst_11 = arith.constant 0.000000e+00 : f32
    %13 = vector.broadcast %cst_11 : f32 to vector<8x128xf32>
    %14 = arith.maximumf %12, %13 : vector<8x128xf32>
    %c0_12 = arith.constant 0 : index
    %c0_13 = arith.constant 0 : index
    %15 = vector.load %arg6[%c0_12, %c0_13] : memref<128x128xf32, #tpu.memory_space<vmem>>, vector<128x128xf32>
    %cst_14 = arith.constant dense<0.000000e+00> : vector<8x128xf32>
    %16 = tpu.matmul %14, %15, %cst_14 {dimension_numbers = #tpu.dot_dimension_numbers<[1], [0], [0], [1], [0, 0, 1, 1], [], []>} : vector<8x128xf32>, vector<128x128xf32>, vector<8x128xf32> -> vector<8x128xf32>
    %c0_15 = arith.constant 0 : index
    %c0_16 = arith.constant 0 : index
    %17 = vector.load %arg7[%c0_15, %c0_16] : memref<1x128xf32, #tpu.memory_space<vmem>>, vector<1x128xf32>
    %18 = vector.broadcast %17 : vector<1x128xf32> to vector<8x128xf32>
    %19 = arith.addf %16, %18 : vector<8x128xf32>
    %cst_17 = arith.constant 0.000000e+00 : f32
    %20 = vector.broadcast %cst_17 : f32 to vector<8x128xf32>
    %21 = arith.maximumf %19, %20 : vector<8x128xf32>
    %c0_18 = arith.constant 0 : index
    %c0_19 = arith.constant 0 : index
    %22 = vector.load %arg8[%c0_18, %c0_19] : memref<128x128xf32, #tpu.memory_space<vmem>>, vector<128x128xf32>
    %cst_20 = arith.constant dense<0.000000e+00> : vector<8x128xf32>
    %23 = tpu.matmul %21, %22, %cst_20 {dimension_numbers = #tpu.dot_dimension_numbers<[1], [0], [0], [1], [0, 0, 1, 1], [], []>} : vector<8x128xf32>, vector<128x128xf32>, vector<8x128xf32> -> vector<8x128xf32>
    %c0_21 = arith.constant 0 : index
    %c0_22 = arith.constant 0 : index
    %24 = vector.load %arg9[%c0_21, %c0_22] : memref<1x128xf32, #tpu.memory_space<vmem>>, vector<1x128xf32>
    %25 = vector.broadcast %24 : vector<1x128xf32> to vector<8x128xf32>
    %26 = arith.addf %23, %25 : vector<8x128xf32>
    %27 = vector.extract_strided_slice %26 {offsets = [0, 0], sizes = [8, 2], strides = [1, 1]} : vector<8x128xf32> to vector<8x2xf32>
    %cst_23 = arith.constant 0.000000e+00 : f32
    %28 = vector.broadcast %cst_23 : f32 to vector<8x2xf32>
    %29 = arith.maximumf %27, %28 : vector<8x2xf32>
    %30 = math.absf %27 : vector<8x2xf32>
    %cst_24 = arith.constant 0.000000e+00 : f32
    %31 = vector.broadcast %cst_24 : f32 to vector<8x2xf32>
    %32 = arith.subf %31, %30 : vector<8x2xf32>
    %33 = math.exp %32 : vector<8x2xf32>
    %34 = math.log1p %33 : vector<8x2xf32>
    %35 = arith.addf %29, %34 : vector<8x2xf32>
    %cst_25 = arith.constant 1.000000e+00 : f32
    %36 = vector.broadcast %cst_25 : f32 to vector<8x2xf32>
    %37 = arith.addf %35, %36 : vector<8x2xf32>
    %c0_26 = arith.constant 0 : index
    %c0_27 = arith.constant 0 : index
    %38 = vector.load %arg10[%c0_26, %c0_27] : memref<8x2xf32, #tpu.memory_space<vmem>>, vector<8x2xf32>
    tpu.vector_store %arg10[%c0_26, %c0_27], %37 {strides = array<i32>} : memref<8x2xf32, #tpu.memory_space<vmem>>, vector<8x2xf32>,
    return
  }
  func.func @transform_0(%arg0: i32) -> (i32, i32) {
    %c0_i32 = arith.constant 0 : i32
    %c0_i32_0 = arith.constant 0 : i32
    return %arg0, %c0_i32 : i32, i32
  }
  func.func @transform_1(%arg0: i32) -> (i32, i32) {
    %c0_i32 = arith.constant 0 : i32
    %c0_i32_0 = arith.constant 0 : i32
    %c0_i32_1 = arith.constant 0 : i32
    return %c0_i32, %c0_i32_0 : i32, i32
  }
  func.func @transform_2(%arg0: i32) -> (i32, i32) {
    %c0_i32 = arith.constant 0 : i32
    %c0_i32_0 = arith.constant 0 : i32
    %c0_i32_1 = arith.constant 0 : i32
    return %c0_i32, %c0_i32_0 : i32, i32
  }
  func.func @transform_3(%arg0: i32) -> (i32, i32) {
    %c0_i32 = arith.constant 0 : i32
    %c0_i32_0 = arith.constant 0 : i32
    %c0_i32_1 = arith.constant 0 : i32
    return %c0_i32, %c0_i32_0 : i32, i32
  }
  func.func @transform_4(%arg0: i32) -> (i32, i32) {
    %c0_i32 = arith.constant 0 : i32
    %c0_i32_0 = arith.constant 0 : i32
    %c0_i32_1 = arith.constant 0 : i32
    return %c0_i32, %c0_i32_0 : i32, i32
  }
  func.func @transform_5(%arg0: i32) -> (i32, i32) {
    %c0_i32 = arith.constant 0 : i32
    %c0_i32_0 = arith.constant 0 : i32
    %c0_i32_1 = arith.constant 0 : i32
    return %c0_i32, %c0_i32_0 : i32, i32
  }
  func.func @transform_6(%arg0: i32) -> (i32, i32) {
    %c0_i32 = arith.constant 0 : i32
    %c0_i32_0 = arith.constant 0 : i32
    %c0_i32_1 = arith.constant 0 : i32
    return %c0_i32, %c0_i32_0 : i32, i32
  }
  func.func @transform_7(%arg0: i32) -> (i32, i32) {
    %c0_i32 = arith.constant 0 : i32
    %c0_i32_0 = arith.constant 0 : i32
    %c0_i32_1 = arith.constant 0 : i32
    return %c0_i32, %c0_i32_0 : i32, i32
  }
  func.func @transform_8(%arg0: i32) -> (i32, i32) {
    %c0_i32 = arith.constant 0 : i32
    %c0_i32_0 = arith.constant 0 : i32
    %c0_i32_1 = arith.constant 0 : i32
    return %c0_i32, %c0_i32_0 : i32, i32
  }
  func.func @transform_9(%arg0: i32) -> (i32, i32) {
    %c0_i32 = arith.constant 0 : i32
    %c0_i32_0 = arith.constant 0 : i32
    return %arg0, %c0_i32 : i32, i32
  }
}

</mosaic_0001>

<bundles_post_ra>
// kernel: tpu_custom_call.1
= control target key start
LH: loop header
LB: loop body
LE: loop exit
PB: predicated region body
PF: predicated region fallthrough
CT: control target
= control target key end

     0   :  { %14 = vsyncpa [#allocation3], 0  ;;  %s1075_s0 = inlined_call_operand.hbm [shape: f32[8,44], index: 0, kind: input, shape index: {}]   ;;  %s1076_s1 = inlined_call_operand.hbm [shape: f32[44,256], index: 1, kind: input, shape index: {}]   ;;  %s1077_s2 = inlined_call_operand.vmem [shape: f32[1,256], index: 2, kind: input, shape index: {}]   ;;  %s1078_s3 = inlined_call_operand.hbm [shape: f32[256,128], index: 3, kind: input, shape index: {}]   ;;  %s1079_s4 = inlined_call_operand.vmem [shape: f32[1,128], index: 4, kind: input, shape index: {}]   ;;  %s1080_s5 = inlined_call_operand.hbm [shape: f32[128,128], index: 5, kind: input, shape index: {}]   ;;  %s1081_s6 = inlined_call_operand.vmem [shape: f32[1,128], index: 6, kind: input, shape index: {}]   ;;  %s1082_s7 = inlined_call_operand.hbm [shape: f32[128,128], index: 7, kind: input, shape index: {}]   ;;  %s1083_s8 = inlined_call_operand.vmem [shape: f32[1,128], index: 8, kind: input, shape index: {}]   ;;  %s1084_s9 = inlined_call_operand.vmem [shape: f32[8,2], index: 9, kind: output, shape index: {}]  }
   0x1   :  { %15 = vsyncpa [#allocation5], 0 }
   0x2   :  { %16 = vsyncpa [#allocation8], 0  ;;  %s901_s30 = smov [#allocation4]   ;;  %s785_s13 = scalar_lea.hbm %s1076_s1, 1536 }
   0x3   :  { %s32_s10 = sshll.u32 %s901_s30, 4  ;;  %p786_p0 = scmp.ne.s32.totalorder %s1076_s1, %s785_s13  ;;  %s33_s10 = int_to_ptr.vmem [resolvable:$true] %s32_s10 }
   0x4   :  { %p789_p1 = scmp.lt.u32.totalorder %s785_s13, %s1076_s1 }
   0x6   :  { %p791_p2 = pnand %p789_p1, %p786_p0 }
   0x8   :  { %794 = shalt.err (!%p791_p2)
}
   0x9   :  { %s795_s18 = scalar_lea.vmem %s33_s10, 1536  ;;  %p800_p4 = scmp.lt.s32.totalorder %s33_s10, %s33_s10 }
   0xa   :  { %p796_p3 = scmp.ne.s32.totalorder %s33_s10, %s795_s18  ;;  %p801_p5 = scmp.lt.s32.totalorder %s795_s18, %s795_s18 }
   0xc   :  { %p802_p6 = por %p801_p5, %p800_p4 }
   0xe   :  { %p803_p7 = pnand %p802_p6, %p796_p3 }
  0x10   :  { %806 = shalt.err (!%p803_p7)
}
  0x11   :  { %s902_s19 = smov 256   ;;  %s903_s20 = smov 16  }
  0x12   :  { %38 = dma.hbm_to_vmem [thread:$0]  %s1076_s1, 1536, %s33_s10, [#allocation5], %s902_s19, %s902_s19, %s903_s20  }
  0x13   :  { %s904_s23 = smov [#allocation7]   ;;  %s905_s25 = smov [#allocation2]  }
  0x14   :  { %s60_s24 = sshll.u32 %s904_s23, 4  ;;  %s23_s26 = sshll.u32 %s905_s25, 4  ;;  %s61_s24 = int_to_ptr.vmem [resolvable:$true] %s60_s24  ;;  %s24_s26 = int_to_ptr.vmem [resolvable:$true] %s23_s26 }
  0x15   :  { %s807_s29 = scalar_lea.hbm %s1080_s5, 2048 }
  0x16   :  { %p808_p8 = scmp.ne.s32.totalorder %s1080_s5, %s807_s29  ;;  %p811_p9 = scmp.lt.u32.totalorder %s807_s29, %s1080_s5 }
  0x18   :  { %p813_p10 = pnand %p811_p9, %p808_p8 }
  0x1a   :  { %816 = shalt.err (!%p813_p10)
}
  0x1b   :  { %s817_s1 = scalar_lea.vmem %s61_s24, 2048  ;;  %p822_p12 = scmp.lt.s32.totalorder %s61_s24, %s61_s24 }
  0x1c   :  { %p818_p11 = scmp.ne.s32.totalorder %s61_s24, %s817_s1  ;;  %p823_p13 = scmp.lt.s32.totalorder %s817_s1, %s817_s1 }
  0x1e   :  { %p824_p0 = por %p823_p13, %p822_p12 }
  0x20   :  { %p825_p1 = pnand %p824_p0, %p818_p11 }
  0x22   :  { %828 = shalt.err (!%p825_p1)
}
  0x23   :  { %s906_s10 = smov 128   ;;  %s907_s14 = smov 8  }
  0x24   :  { %66 = dma.hbm_to_vmem [thread:$0]  %s1080_s5, 2048, %s61_s24, [#allocation8], %s906_s10, %s906_s10, %s907_s14  }
  0x25   :  { %s829_s19 = scalar_lea.hbm %s1075_s0, 128 }
  0x26   :  { %p830_p2 = scmp.ne.s32.totalorder %s1075_s0, %s829_s19  ;;  %p833_p3 = scmp.lt.u32.totalorder %s829_s19, %s1075_s0 }
  0x28   :  { %p835_p4 = pnand %p833_p3, %p830_p2 }
  0x2a   :  { %838 = shalt.err (!%p835_p4)
}
  0x2b   :  { %s839_s25 = scalar_lea.vmem %s24_s26, 128  ;;  %p844_p6 = scmp.lt.s32.totalorder %s24_s26, %s24_s26 }
  0x2c   :  { %p840_p5 = scmp.ne.s32.totalorder %s24_s26, %s839_s25  ;;  %p845_p7 = scmp.lt.s32.totalorder %s839_s25, %s839_s25 }
  0x2e   :  { %p846_p8 = por %p845_p7, %p844_p6 }
  0x30   :  { %p847_p9 = pnand %p846_p8, %p840_p5 }
  0x32   :  { %850 = shalt.err (!%p847_p9)
}
  0x33   :  { %26 = dma.hbm_to_vmem [thread:$0]  %s1075_s0, 128, %s24_s26, [#allocation3]  }
  0x34   :  { %s908_s27 = smov [#allocation6]   ;;  %s909_s29 = smov [#allocation9]  }
  0x35   :  { %s46_s28 = sshll.u32 %s908_s27, 4  ;;  %s74_s30 = sshll.u32 %s909_s29, 4  ;;  %s47_s28 = int_to_ptr.vmem [resolvable:$true] %s46_s28  ;;  %s75_s30 = int_to_ptr.vmem [resolvable:$true] %s74_s30 }
  0x36   :  { %s851_s13 = scalar_lea.hbm %s1078_s3, 4096 }
  0x37   :  { %p852_p10 = scmp.ne.s32.totalorder %s1078_s3, %s851_s13  ;;  %p855_p11 = scmp.lt.u32.totalorder %s851_s13, %s1078_s3 }
  0x39   :  { %p857_p12 = pnand %p855_p11, %p852_p10 }
  0x3b   :  { %860 = shalt.err (!%p857_p12)
}
  0x3c   :  { %s861_s0 = scalar_lea.vmem %s47_s28, 4096  ;;  %p866_p0 = scmp.lt.s32.totalorder %s47_s28, %s47_s28 }
  0x3d   :  { %p862_p13 = scmp.ne.s32.totalorder %s47_s28, %s861_s0  ;;  %p867_p1 = scmp.lt.s32.totalorder %s861_s0, %s861_s0 }
  0x3f   :  { %p868_p2 = por %p867_p1, %p866_p0 }
  0x41   :  { %p869_p3 = pnand %p868_p2, %p862_p13 }
  0x43   :  { %872 = shalt.err (!%p869_p3)
}
  0x44   :  { %52 = dma.hbm_to_vmem [thread:$0]  %s1078_s3, 4096, %s47_s28, [#allocation5], %s906_s10, %s906_s10, %s907_s14  }
  0x45   :  { %s873_s21 = scalar_lea.hbm %s1082_s7, 2048 }
  0x46   :  { %p874_p4 = scmp.ne.s32.totalorder %s1082_s7, %s873_s21  ;;  %p877_p5 = scmp.lt.u32.totalorder %s873_s21, %s1082_s7 }
  0x48   :  { %p879_p6 = pnand %p877_p5, %p874_p4 }
  0x4a   :  { %882 = shalt.err (!%p879_p6)
}
  0x4b   :  { %s883_s24 = scalar_lea.vmem %s75_s30, 2048  ;;  %p888_p8 = scmp.lt.s32.totalorder %s75_s30, %s75_s30 }
  0x4c   :  { %p884_p7 = scmp.ne.s32.totalorder %s75_s30, %s883_s24  ;;  %p889_p9 = scmp.lt.s32.totalorder %s883_s24, %s883_s24 }
  0x4e   :  { %p890_p10 = por %p889_p9, %p888_p8 }
  0x50   :  { %p891_p11 = pnand %p890_p10, %p884_p7 }
  0x52   :  { %894 = shalt.err (!%p891_p11)
}
  0x53   :  { %80 = dma.hbm_to_vmem [thread:$0]  %s1082_s7, 2048, %s75_s30, [#allocation8], %s906_s10, %s906_s10, %s907_s14  }
  0x54   :  { %895 = dma.done.wait [#allocation3], 128  }
  0x55   :  { %896 = vsyncadd [#allocation3], 4294967168 }
  0x56   :  { %897 = dma.done.wait [#allocation5], 5632  }
  0x57   :  { %898 = vsyncadd [#allocation5], 4294961664 }
  0x58   :  { %899 = dma.done.wait [#allocation8], 4096  }
  0x59   :  { %900 = vsyncadd [#allocation8], 4294963200  ;;  %v910_v0 = vmov 0.0   ;;  %v100_v1 = vld [vmem:[#allocation4 + $0x8] sm:$0xff]  ;;  %v102_v2 = vld [vmem:[#allocation4 + $0x18] sm:$0xff]  ;;  %vm127_vm0 = vcmask 1043456  }
  0x5a   :  { %198 = vmatprep.mubr.f32.mxu0 %v910_v0  ;;  %v99_v3 = vld [vmem:[#allocation4] sm:$0xff]  ;;  %v674_v4 = vpack.c.bf16 %v102_v2, %v100_v1  ;;  %v101_v5 = vld [vmem:[#allocation4 + $0x10] sm:$0xff]  ;;  %v104_v6 = vld [vmem:[#allocation4 + $0x28] sm:$0xff]  ;;  %vm911_vm1 = vmmov 1   ;;  %vm123_vm3 = vcmask 359424   ;;  %vm913_vm4 = vmmov 0  }
  0x5b   :  { %v106_v7 = vld [vmem:[#allocation4 + $0x38] sm:$0xff]  ;;  %v676_v8 = vpack.c.bf16 %v101_v5, %v99_v3  ;;  %v103_v10 = vld [vmem:[#allocation4 + $0x20] sm:$0xff]  ;;  %v105_v11 = vld [vmem:[#allocation4 + $0x30] sm:$0xff]  ;;  %vm520_vm6 = vcmask 15360  }
  0x5c   :  { %v678_v9 = vpack.c.bf16 %v106_v7, %v104_v6  ;;  %v108_v12 = vld [vmem:[#allocation4 + $0x48] sm:$0xff]  ;;  %675 = vmatprep.subr.bf16.mxu0 %v674_v4  ;;  %v110_v13 = vld [vmem:[#allocation4 + $0x58] sm:$0xf]  ;;  %vm1034_vm2 = vmpackc.low %vm127_vm0, %vm911_vm1  ;;  %v680_v16 = vpack.c.bf16 %v105_v11, %v103_v10 }
  0x5d   :  { %v107_v15 = vld [vmem:[#allocation4 + $0x40] sm:$0xff]  ;;  %677 = vmatpush1.bf16.msra.mxu0 %v676_v8  ;;  %v109_v17 = vld [vmem:[#allocation4 + $0x50] sm:$0xf]  ;;  %v224_v19 = vld [vmem:[#allocation6 + $0x88] sm:$0xff]  ;;  %v682_v20 = vpack.c.bf16 %v110_v13, %v108_v12 }
  0x5e   :  { %v223_v18 = vld [vmem:[#allocation6 + $0x80] sm:$0xff]  ;;  %679 = vmatprep.subr.bf16.mxu0 %v678_v9  ;;  %v208_v23 = vld [vmem:[#allocation6 + $0x8] sm:$0xff]  ;;  %v225_v24 = vld [vmem:[#allocation6 + $0x90] sm:$0xff]  ;;  %v685_v32 = vpack.c.bf16 %v109_v17, %v107_v15  ;;  %v912_v9 = vmov 0.0|0.0  }
  0x5f   :  { %v688_v21 = vpack.c.bf16 %v224_v19, %v223_v18  ;;  %v207_v22 = vld [vmem:[#allocation6] sm:$0xff]  ;;  %v226_v26 = vld [vmem:[#allocation6 + $0x98] sm:$0xff]  ;;  %v209_v27 = vld [vmem:[#allocation6 + $0x10] sm:$0xff] }
  0x60   :  { %v690_v25 = vpack.c.bf16 %v208_v23, %v207_v22  ;;  %v210_v28 = vld [vmem:[#allocation6 + $0x18] sm:$0xff]  ;;  %v692_v29 = vpack.c.bf16 %v226_v26, %v225_v24  ;;  %v227_v30 = vld [vmem:[#allocation6 + $0xa0] sm:$0xff]  ;;  %v228_v31 = vld [vmem:[#allocation6 + $0xa8] sm:$0xff] }
  0x61   :  { %689 = vmatprep.subr.bf16.mxu1 %v688_v21  ;;  %681 = vmatpush1.bf16.msra.mxu0 %v680_v16  ;;  %v694_v33 = vpack.c.bf16 %v210_v28, %v209_v27  ;;  %v696_v34 = vpack.c.bf16 %v228_v31, %v227_v30  ;;  %v211_v35 = vld [vmem:[#allocation6 + $0x20] sm:$0xff]  ;;  %v212_v36 = vld [vmem:[#allocation6 + $0x28] sm:$0xff]  ;;  %v229_v37 = vld [vmem:[#allocation6 + $0xb0] sm:$0xff] }
  0x62   :  { %691 = vmatpush3.bf16.msra.mxu1 %v690_v25  ;;  %684 = vmatprep.subr.msk.bf16.mxu0 %vm1034_vm2, %v682_v20  ;;  %v230_v38 = vld [vmem:[#allocation6 + $0xb8] sm:$0xff]  ;;  %v698_v40 = vpack.c.bf16 %v212_v36, %v211_v35  ;;  %v213_v42 = vld [vmem:[#allocation6 + $0x30] sm:$0xff]  ;;  %v231_v44 = vld [vmem:[#allocation6 + $0xc0] sm:$0xff]  ;;  %v113_v25 = vlaneseq }
  0x63   :  { %693 = vmatprep.subr.bf16.mxu1 %v692_v29  ;;  %v98_v39 = vld [vmem:[#allocation2] sm:$0xff]  ;;  %v700_v41 = vpack.c.bf16 %v230_v38, %v229_v37  ;;  %v232_v45 = vld [vmem:[#allocation6 + $0xc8] sm:$0xff]  ;;  %v215_v48 = vld [vmem:[#allocation6 + $0x40] sm:$0xff] }
  0x64   :  { %v214_v43 = vld [vmem:[#allocation6 + $0x38] sm:$0xff]  ;;  %v704_v47 = vpack.c.bf16 %v232_v45, %v231_v44  ;;  %v216_v49 = vld [vmem:[#allocation6 + $0x48] sm:$0xff]  ;;  %v233_v50 = vld [vmem:[#allocation6 + $0xd0] sm:$0xff]  ;;  %v114_v26 = vshrl.u32 %v113_v25, 7 }
  0x65   :  { %687 = vmatpush1.bf16.msk.msra.mxu0 %vm1034_vm2, %v685_v32  ;;  %v702_v46 = vpack.c.bf16 %v214_v43, %v213_v42  ;;  %v234_v51 = vld [vmem:[#allocation6 + $0xd8] sm:$0xff]  ;;  %v706_v52 = vpack.c.bf16 %v216_v49, %v215_v48  ;;  %v217_v54 = vld [vmem:[#allocation6 + $0x50] sm:$0xff]  ;;  %v235_v56 = vld [vmem:[#allocation6 + $0xe0] sm:$0xff] }
  0x66   :  { %695 = vmatpush3.bf16.msra.mxu1 %v694_v33  ;;  %v708_v53 = vpack.c.bf16 %v234_v51, %v233_v50  ;;  %v218_v55 = vld [vmem:[#allocation6 + $0x58] sm:$0xff]  ;;  %v236_v57 = vld [vmem:[#allocation6 + $0xe8] sm:$0xff]  ;;  %v219_v60 = vld [vmem:[#allocation6 + $0x60] sm:$0xff]  ;;  %720 = vmatprep.subr.bf16.mxu0 %v912_v9  ;;  %v115_v27 = vsub.s32 0, %v114_v26  ;;  %v119_v29 = vsub.s32 1, %v114_v26 }
  0x67   :  { %697 = vmatprep.subr.bf16.mxu1 %v696_v34  ;;  %v710_v58 = vpack.c.bf16 %v218_v55, %v217_v54  ;;  %v712_v59 = vpack.c.bf16 %v236_v57, %v235_v56  ;;  %v220_v61 = vld [vmem:[#allocation6 + $0x68] sm:$0xff]  ;;  %v237_v63 = vld [vmem:[#allocation6 + $0xf0] sm:$0xff]  ;;  %v238_v1 = vld [vmem:[#allocation6 + $0xf8] sm:$0xff] }
  0x68   :  { %531 = vmatmul.mubr.msk.f32.vlgmr.msra.gmra.mrb[0].mxu0 %vm123_vm3, %v98_v39  ;;  %v714_v62 = vpack.c.bf16 %v220_v61, %v219_v60  ;;  %v716_v2 = vpack.c.bf16 %v238_v1, %v237_v63  ;;  %v221_v3 = vld [vmem:[#allocation6 + $0x70] sm:$0xff]  ;;  %v222_v4 = vld [vmem:[#allocation6 + $0x78] sm:$0xff]  ;;  %v317_v6 = vld [vmem:[#allocation7] sm:$0xff] }
  0x69   :  { %v718_v5 = vpack.c.bf16 %v222_v4, %v221_v3  ;;  %v318_v7 = vld [vmem:[#allocation7 + $0x8] sm:$0xff]  ;;  %v319_v8 = vld [vmem:[#allocation7 + $0x10] sm:$0xff]  ;;  %v320_v11 = vld [vmem:[#allocation7 + $0x18] sm:$0xff]  ;;  %636 = vmatprep.mubr.msk.f32.mxu0 %vm913_vm4, %v910_v0 }
  0x6a   :  { %699 = vmatpush3.bf16.msra.mxu1 %v698_v40  ;;  %v721_v10 = vpack.c.bf16 %v318_v7, %v317_v6  ;;  %v724_v12 = vpack.c.bf16 %v320_v11, %v319_v8  ;;  %v321_v13 = vld [vmem:[#allocation7 + $0x20] sm:$0xff]  ;;  %v322_v14 = vld [vmem:[#allocation7 + $0x28] sm:$0xff]  ;;  %v323_v16 = vld [vmem:[#allocation7 + $0x30] sm:$0xff] }
  0x6b   :  { %701 = vmatprep.subr.bf16.mxu1 %v700_v41  ;;  %v727_v15 = vpack.c.bf16 %v322_v14, %v321_v13  ;;  %v324_v17 = vld [vmem:[#allocation7 + $0x38] sm:$0xff]  ;;  %v325_v19 = vld [vmem:[#allocation7 + $0x40] sm:$0xff]  ;;  %v326_v20 = vld [vmem:[#allocation7 + $0x48] sm:$0xff] }
  0x6c   :  { %722 = vmatpush3.bf16.msra.mxu0 %v721_v10  ;;  %v730_v18 = vpack.c.bf16 %v324_v17, %v323_v16  ;;  %v733_v21 = vpack.c.bf16 %v326_v20, %v325_v19  ;;  %v327_v22 = vld [vmem:[#allocation7 + $0x50] sm:$0xff]  ;;  %v328_v23 = vld [vmem:[#allocation7 + $0x58] sm:$0xff]  ;;  %v329_v38 = vld [vmem:[#allocation7 + $0x60] sm:$0xff] }
  0x6d   :  { %723 = vmatprep.subr.bf16.mxu0 %v912_v9  ;;  %v736_v24 = vpack.c.bf16 %v328_v23, %v327_v22  ;;  %v111_v28 = vld [vmem:[%s1077_s2] sm:$0x3]  ;;  %v330_v39 = vld [vmem:[#allocation7 + $0x68] sm:$0xff]  ;;  %v332_v42 = vld [vmem:[#allocation7 + $0x78] sm:$0xff] }
  0x6e   :  { %703 = vmatpush3.bf16.msra.mxu1 %v702_v46  ;;  %v116_v30 = vrot.slane %v111_v28, %v115_v27  ;;  %v120_v31 = vrot.slane %v111_v28, %v119_v29  ;;  %v739_v40 = vpack.c.bf16 %v330_v39, %v329_v38  ;;  %v331_v41 = vld [vmem:[#allocation7 + $0x70] sm:$0xff]  ;;  %v411_v44 = vld [vmem:[#allocation9] sm:$0xff]  ;;  %v412_v45 = vld [vmem:[#allocation9 + $0x8] sm:$0xff] }
  0x6f   :  { %705 = vmatprep.subr.bf16.mxu1 %v704_v47  ;;  %v742_v43 = vpack.c.bf16 %v332_v42, %v331_v41  ;;  %v413_v46 = vld [vmem:[#allocation9 + $0x10] sm:$0xff]  ;;  %v745_v47 = vpack.c.bf16 %v412_v45, %v411_v44  ;;  %v414_v48 = vld [vmem:[#allocation9 + $0x18] sm:$0xff]  ;;  %v415_v50 = vld [vmem:[#allocation9 + $0x20] sm:$0xff] }
  0x70   :  { %725 = vmatpush3.bf16.msra.mxu0 %v724_v12  ;;  %v748_v49 = vpack.c.bf16 %v414_v48, %v413_v46  ;;  %v416_v51 = vld [vmem:[#allocation9 + $0x28] sm:$0xff]  ;;  %v418_v54 = vld [vmem:[#allocation9 + $0x38] sm:$0xff]  ;;  %v423_v61 = vld [vmem:[#allocation9 + $0x60] sm:$0xff] }
  0x71   :  { %726 = vmatprep.subr.bf16.mxu0 %v912_v9  ;;  %v420_v56 = vld [vmem:[#allocation9 + $0x48] sm:$0xff]  ;;  %v425_v7 = vld [vmem:[#allocation9 + $0x70] sm:$0xff]  ;;  %v426_v8 = vld [vmem:[#allocation9 + $0x78] sm:$0xff] }
  0x72   :  { %707 = vmatpush3.bf16.msra.mxu1 %v706_v52  ;;  %v751_v52 = vpack.c.bf16 %v416_v51, %v415_v50  ;;  %v766_v10 = vpack.c.bf16 %v426_v8, %v425_v7  ;;  %v533_v11 = vld [vmem:[%s1081_s6] ss:$0 sm:$0xff] }
  0x73   :  { %709 = vmatprep.subr.bf16.mxu1 %v708_v53  ;;  %v417_v53 = vld [vmem:[#allocation9 + $0x30] sm:$0xff] }
  0x74   :  { %728 = vmatpush3.bf16.msra.mxu0 %v727_v15  ;;  %v754_v55 = vpack.c.bf16 %v418_v54, %v417_v53  ;;  %v534_v15 = vld [vmem:[%s1083_s8] ss:$0 sm:$0xff] }
  0x75   :  { %729 = vmatprep.subr.bf16.mxu0 %v912_v9 }
  0x76   :  { %711 = vmatpush3.bf16.msra.mxu1 %v710_v58  ;;  %v421_v58 = vld [vmem:[#allocation9 + $0x50] sm:$0xff] }
  0x77   :  { %713 = vmatprep.subr.bf16.mxu1 %v712_v59  ;;  %v422_v59 = vld [vmem:[#allocation9 + $0x58] sm:$0xff] }
  0x78   :  { %731 = vmatpush3.bf16.msra.mxu0 %v730_v18  ;;  %v760_v60 = vpack.c.bf16 %v422_v59, %v421_v58 }
  0x79   :  { %732 = vmatprep.subr.bf16.mxu0 %v912_v9 }
  0x7a   :  { %715 = vmatpush3.bf16.msra.mxu1 %v714_v62  ;;  %v424_v62 = vld [vmem:[#allocation9 + $0x68] sm:$0xff] }
  0x7b   :  { %717 = vmatprep.subr.bf16.mxu1 %v716_v2  ;;  %v763_v63 = vpack.c.bf16 %v424_v62, %v423_v61  ;;  %v532_v2 = vld [vmem:[%s1079_s4] ss:$0 sm:$0xff] }
  0x7c   :  { %734 = vmatpush3.bf16.msra.mxu0 %v733_v21 }
  0x7d   :  { %735 = vmatprep.subr.bf16.mxu0 %v912_v9 }
  0x7e   :  { %719 = vmatpush3.bf16.msra.mxu1 %v718_v5 }
  0x7f   :  { %744 = vmatprep.subr.bf16.mxu1 %v912_v9 }
  0x80   :  { %737 = vmatpush3.bf16.msra.mxu0 %v736_v24 }
  0x81   :  { %738 = vmatprep.subr.bf16.mxu0 %v912_v9 }
  0x84   :  { %740 = vmatpush3.bf16.msra.mxu0 %v739_v40 }
  0x85   :  { %741 = vmatprep.subr.bf16.mxu0 %v912_v9 }
  0x88   :  { %743 = vmatpush3.bf16.msra.mxu0 %v742_v43 }
 0x13b   :  { %v200_v32 = vpop.f32.mrb[0].mxu0 }
 0x13c   :  { %v201_v33 = vadd.f32 %v200_v32, %v116_v30  ;;  %v202_v34 = vpop.f32.mrb[1].mxu0 }
 0x13d   :  { %v203_v35 = vadd.f32 %v202_v34, %v120_v31 }
 0x13e   :  { %v205_v37 = vmax.f32 %v201_v33, 0.0 }
 0x13f   :  { %v206_v36 = vmax.f32 %v203_v35, 0.0 }
 0x141   :  { %310 = vmatprep.mubr.f32.mxu1 %v206_v36 }
 0x142   :  { %311 = vmatmul.mubr.f32.vlgmr.msra.gmra.mrb[0].mxu1 %v205_v37 }
 0x143   :  { %671 = vmatprep.mubr.msk.f32.mxu1 %vm913_vm4, %v910_v0  ;;  %746 = vmatpush3.bf16.msra.mxu1 %v745_v47  ;;  %v419_v0 = vld [vmem:[#allocation9 + $0x40] sm:$0xff] }
 0x144   :  { %747 = vmatprep.subr.bf16.mxu1 %v912_v9  ;;  %v757_v57 = vpack.c.bf16 %v420_v56, %v419_v0 }
 0x147   :  { %749 = vmatpush3.bf16.msra.mxu1 %v748_v49 }
 0x148   :  { %750 = vmatprep.subr.bf16.mxu1 %v912_v9 }
 0x14b   :  { %752 = vmatpush3.bf16.msra.mxu1 %v751_v52 }
 0x14c   :  { %753 = vmatprep.subr.bf16.mxu1 %v912_v9 }
 0x14f   :  { %755 = vmatpush3.bf16.msra.mxu1 %v754_v55 }
 0x150   :  { %756 = vmatprep.subr.bf16.mxu1 %v912_v9 }
 0x153   :  { %758 = vmatpush3.bf16.msra.mxu1 %v757_v57 }
 0x154   :  { %759 = vmatprep.subr.bf16.mxu1 %v912_v9 }
 0x157   :  { %761 = vmatpush3.bf16.msra.mxu1 %v760_v60 }
 0x158   :  { %762 = vmatprep.subr.bf16.mxu1 %v912_v9 }
 0x15b   :  { %764 = vmatpush3.bf16.msra.mxu1 %v763_v63 }
 0x15c   :  { %765 = vmatprep.subr.bf16.mxu1 %v912_v9 }
 0x15f   :  { %767 = vmatpush3.bf16.msra.mxu1 %v766_v10 }
 0x215   :  { %v567_v1 = vpop.f32.mrb[0].mxu1 }
 0x216   :  { %v568_v3 = vpop.f32.mrb[1].mxu1 }
 0x217   :  { %v569_v4 = vadd.f32 %v568_v3, %v567_v1 }
 0x219   :  { %v313_v5 = vadd.f32 %v569_v4, %v532_v2 }
 0x21b   :  { %v316_v6 = vmax.f32 %v313_v5, 0.0 }
 0x21d   :  { %637 = vmatmul.mubr.f32.vlgmr.msra.gmra.mrb[2].mxu0 %v316_v6 }
 0x2f0   :  { %v406_v12 = vpop.f32.mrb[2].mxu0 }
 0x2f1   :  { %v407_v9 = vadd.f32 %v533_v11, %v406_v12  ;;  %v638_v13 = vpop.f32.mrb[3].mxu0 }
 0x2f3   :  { %v410_v14 = vmax.f32 %v407_v9, 0.0 }
 0x2f5   :  { %672 = vmatmul.mubr.f32.vlgmr.msra.gmra.mrb[2].mxu1 %v410_v14 }
 0x3c8   :  { %v500_v16 = vpop.f32.mrb[2].mxu1 }
 0x3c9   :  { %v501_v17 = vadd.f32 %v534_v15, %v500_v16  ;;  %v673_v18 = vpop.f32.mrb[3].mxu1 }
 0x3cb   :  { %v505_v19 = vand.u32 2147483647, %v501_v17  ;;  %v504_v30 = vmax.f32 %v501_v17, 0.0 }
 0x3cd   :  { %v506_v20 = vsub.f32 0.0, %v505_v19 }
 0x3cf   :  { %v507_v21 = vmul.f32 1.442695, %v506_v20 }
 0x3d1   :  { %781 = vpow2.f32 %v507_v21 }
 0x3db   :  { %v782_v22 = vpop.eup %781 }
 0x3dc   :  { %v509_v23 = vadd.f32 1.0, %v782_v22  ;;  %v512_v24 = vmul.f32 -0.5, %v782_v22  ;;  %v515_v26 = vand.u32 2147483647, %v782_v22 }
 0x3de   :  { %783 = vlog2.f32 %v509_v23  ;;  %v513_v25 = vadd.f32 1.0, %v512_v24  ;;  %vm516_vm5 = vcmp.lt.f32.partialorder %v515_v26, 0.0004427343 }
 0x3e0   :  { %v514_v29 = vmul.f32 %v782_v22, %v513_v25 }
 0x3e8   :  { %v784_v27 = vpop.eup %783 }
 0x3e9   :  { %v511_v28 = vmul.f32 0.6931472, %v784_v27 }
 0x3eb   :  { %v517_v31 = vsel %vm516_vm5, %v514_v29, %v511_v28 }
 0x3ec   :  { %v518_v32 = vadd.f32 %v517_v31, %v504_v30 }
 0x3ee   :  { %v519_v33 = vadd.f32 1.0, %v518_v32 }
 0x3f0   :  { %521 = vst.msk [vmem:[%s1084_s9] sm:$0xff] %vm520_vm6, %v519_v33 }
 0x3f1   :  { %526 = vsyncpa [#allocation3], 1 }
 0x3f2   :  { %527 = vsyncpa [#allocation5], 1 }
 0x3f3   :  { %528 = vsyncpa [#allocation8], 1 }

</bundles_post_ra>
